<compile_context>
chip_gen: v7x
topology: tpu7x:2x2x1
jax: 0.10.0
libtpu: 0.0.40
codegen_flags: <defaults>
</compile_context>

<pallas_src>
import functools
import math

import jax
import jax.numpy as jnp
from jax.experimental import pallas as pl
from jax.experimental.pallas import tpu as pltpu


def _gather_scale_kernel(ids_ref, table_hbm, out_ref, sem, *, token_block, scale):
    """Gather `token_block` embedding rows from HBM into the output block.

    ids_ref   : (N,)   int32, SMEM (scalar prefetch) -- all token ids.
    table_hbm : (V, D) float, HBM (memory_space=pl.ANY) -- embedding table.
    out_ref   : (token_block, D) float, VMEM output block.
    sem       : ()     DMA semaphore shared by every row copy of the block.
    """
    base = pl.program_id(0) * token_block

    # Issue every row DMA for this block; they all run concurrently and all
    # signal the same semaphore with their byte counts.
    @pl.loop(0, token_block)
    def _issue(t):
        tok = ids_ref[base + t]
        pltpu.make_async_copy(
            table_hbm.at[pl.ds(tok, 1), :],      # (1, D) row in HBM
            out_ref.at[pl.ds(t, 1), :],          # (1, D) row of the VMEM block
            sem,
        ).start()

    # Drain the semaphore: one wait per issued row (same shape => same bytes).
    @pl.loop(0, token_block)
    def _wait(t):
        pltpu.make_async_copy(
            table_hbm.at[pl.ds(0, 1), :],        # shape-only; just byte count
            out_ref.at[pl.ds(t, 1), :],
            sem,
        ).wait()

    # Fused sqrt(embedding_dim) scaling; also pins ordering of the gathered
    # data before the pipeline writes the block back to HBM.
    out_ref[...] = out_ref[...] * jnp.asarray(scale, dtype=out_ref.dtype)


def _pick_token_block(n, preferred):
    """Largest block <= preferred that divides n (keeps blocks rectangular)."""
    if n <= preferred:
        return n
    if n % preferred == 0:
        return preferred
    for tb in range(preferred, 0, -1):
        if n % tb == 0:
            return tb
    return 1


def input_embedding(ids, table, *, token_block=128, scale=None):
    """ids: (B, S) int, table: (V, D) float -> (B, S, D) = table[ids] * sqrt(D)."""
    b, s = ids.shape
    v, d = table.shape
    n = b * s
    if scale is None:
        scale = math.sqrt(d)

    tb = _pick_token_block(n, token_block)
    ids_flat = ids.reshape(n).astype(jnp.int32)  # scalar-prefetch arg -> SMEM

    kernel = functools.partial(_gather_scale_kernel, token_block=tb, scale=scale)

    out = pl.pallas_call(
        kernel,
        out_shape=jax.ShapeDtypeStruct((n, d), table.dtype),
        grid_spec=pltpu.PrefetchScalarGridSpec(
            num_scalar_prefetch=1,                      # ids -> SMEM
            grid=(n // tb,),
            in_specs=[
                pl.BlockSpec(memory_space=pl.ANY),      # table stays in HBM
            ],
            out_specs=pl.BlockSpec((tb, d), lambda i, ids: (i, 0)),
            scratch_shapes=[pltpu.SemaphoreType.DMA(())],
        ),
        compiler_params=pltpu.CompilerParams(
            dimension_semantics=("parallel",),          # shard token axis across TCs
            vmem_limit_bytes=32 * 1024 * 1024,          # only 2x output block needed
        ),
    )(ids_flat, table)

    return out.reshape(b, s, d)


def make_embedding_table(key, vocab_size, embedding_dim, padding_idx):
    # nn.Embedding default init: N(0, 1), then the padding_idx row is zeroed.
    table = jax.random.normal(key, (vocab_size, embedding_dim), dtype=jnp.float32)
    table = table.at[padding_idx].set(0.0)
    return table


if __name__ == "__main__":
    # Small shapes consistent with the module: batch=2, seq=8, hidden=32, vocab=64.
    B, S = 2, 8
    EMBEDDING_DIM = 32
    VOCAB_SIZE = 64
    PADDING_IDX = 0

    key = jax.random.PRNGKey(0)
    k_tab, k_ids = jax.random.split(key)

    table = make_embedding_table(k_tab, VOCAB_SIZE, EMBEDDING_DIM, PADDING_IDX)
    ids = jax.random.randint(k_ids, (B, S), 0, VOCAB_SIZE, dtype=jnp.int32)
    # make sure at least one padding token is present
    ids = ids.at[0, 0].set(PADDING_IDX)

    out = input_embedding(ids, table)
    jax.block_until_ready(out)

    # Reference check (plain JAX gather), same semantics as the PyTorch forward.
    ref = table[ids] * math.sqrt(EMBEDDING_DIM)
    assert out.shape == (B, S, EMBEDDING_DIM)
    assert jnp.allclose(out, ref, atol=1e-5, rtol=1e-5)
    # padding row must be exactly zero
    assert jnp.all(out[0, 0] == 0.0)

    print("KERNEL_OK")
</pallas_src>

<mosaic_0001>
module attributes {stable_mosaic.version = 11 : i64} {
  func.func @_gather_scale_kernel(%arg0: i32, %arg1: memref<16xi32, #tpu.memory_space<smem>>, %arg2: memref<64x32xf32, #tpu.memory_space<any>>, %arg3: memref<16x32xf32, #tpu.memory_space<vmem>>, %arg4: memref<!tpu.dma_semaphore, #tpu.memory_space<semaphore_mem>>) attributes {dimension_semantics = [#tpu.dimension_semantics<parallel>], iteration_bounds = array<i64: 1>, scalar_prefetch = 1 : i64, scratch_operands = 1 : i64, tpu.core_type = #tpu.core_type<tc>, window_params = [{}, {transform_indices = @transform_1, window_bounds = array<i64: 16, 32>}]} {
    %c16_i32 = arith.constant 16 : i32
    %0 = arith.muli %arg0, %c16_i32 : i32
    %c0_i32 = arith.constant 0 : i32
    %c16_i32_0 = arith.constant 16 : i32
    %1 = arith.addi %c0_i32, %c16_i32_0 : i32
    %c1_i32 = arith.constant 1 : i32
    scf.for %arg5 = %c0_i32 to %1 step %c1_i32  : i32 {
      %c1_i32_9 = arith.constant 1 : i32
      %7 = arith.muli %arg5, %c1_i32_9 : i32
      %c0_i32_10 = arith.constant 0 : i32
      %8 = arith.addi %c0_i32_10, %7 : i32
      %9 = arith.addi %0, %8 : i32
      %10 = arith.index_cast %9 : i32 to index
      %11 = memref.load %arg1[%10] : memref<16xi32, #tpu.memory_space<smem>>
      %c0_i32_11 = arith.constant 0 : i32
      %12 = tpu.memref_slice %arg2[%11, %c0_i32_11] : memref<64x32xf32, #tpu.memory_space<any>> -> memref<1x32xf32, #tpu.memory_space<any>>
      %c0_i32_12 = arith.constant 0 : i32
      %13 = tpu.memref_slice %arg3[%8, %c0_i32_12] : memref<16x32xf32, #tpu.memory_space<vmem>> -> memref<1x32xf32, #tpu.memory_space<vmem>>
      tpu.enqueue_dma source(%12 : memref<1x32xf32, #tpu.memory_space<any>>) target(%13 : memref<1x32xf32, #tpu.memory_space<vmem>>) target_semaphore(%arg4 : memref<!tpu.dma_semaphore, #tpu.memory_space<semaphore_mem>>)
    }
    %c16_i32_1 = arith.constant 16 : i32
    %c0_i32_2 = arith.constant 0 : i32
    %c16_i32_3 = arith.constant 16 : i32
    %2 = arith.addi %c0_i32_2, %c16_i32_3 : i32
    %c1_i32_4 = arith.constant 1 : i32
    scf.for %arg5 = %c0_i32_2 to %2 step %c1_i32_4  : i32 {
      %c1_i32_9 = arith.constant 1 : i32
      %7 = arith.muli %arg5, %c1_i32_9 : i32
      %c0_i32_10 = arith.constant 0 : i32
      %8 = arith.addi %c0_i32_10, %7 : i32
      %c0_i32_11 = arith.constant 0 : i32
      %c0_i32_12 = arith.constant 0 : i32
      %9 = tpu.memref_slice %arg2[%c0_i32_11, %c0_i32_12] : memref<64x32xf32, #tpu.memory_space<any>> -> memref<1x32xf32, #tpu.memory_space<any>>
      %c0_i32_13 = arith.constant 0 : i32
      %10 = tpu.memref_slice %arg3[%8, %c0_i32_13] : memref<16x32xf32, #tpu.memory_space<vmem>> -> memref<1x32xf32, #tpu.memory_space<vmem>>
      tpu.wait_dma2 semaphore(%arg4 : memref<!tpu.dma_semaphore, #tpu.memory_space<semaphore_mem>>) src(%9 : memref<1x32xf32, #tpu.memory_space<any>>) dst(%10 : memref<1x32xf32, #tpu.memory_space<vmem>>)
    }
    %c16_i32_5 = arith.constant 16 : i32
    %c0 = arith.constant 0 : index
    %c0_6 = arith.constant 0 : index
    %3 = vector.load %arg3[%c0, %c0_6] : memref<16x32xf32, #tpu.memory_space<vmem>>, vector<16x32xf32>
    %cst = arith.constant 5.65685415 : f32
    %4 = vector.broadcast %cst : f32 to vector<16x32xf32>
    %5 = arith.mulf %3, %4 : vector<16x32xf32>
    %c0_7 = arith.constant 0 : index
    %c0_8 = arith.constant 0 : index
    %6 = vector.load %arg3[%c0_7, %c0_8] : memref<16x32xf32, #tpu.memory_space<vmem>>, vector<16x32xf32>
    tpu.vector_store %arg3[%c0_7, %c0_8], %5 {strides = array<i32>} : memref<16x32xf32, #tpu.memory_space<vmem>>, vector<16x32xf32>,
    return
  }
  func.func @transform_1(%arg0: i32, %arg1: memref<16xi32, #tpu.memory_space<smem>>) -> (i32, i32) {
    %c0_i32 = arith.constant 0 : i32
    %c0_i32_0 = arith.constant 0 : i32
    return %arg0, %c0_i32 : i32, i32
  }
}

</mosaic_0001>

<bundles_post_ra>
// kernel: tpu_custom_call.1
= control target key start
LH: loop header
LB: loop body
LE: loop exit
PB: predicated region body
PF: predicated region fallthrough
CT: control target
= control target key end

     0   :  { %s243_s0 = inlined_call_operand.vmem [shape: s32[16], index: 0, kind: input, shape index: {}]   ;;  %s244_s1 = inlined_call_operand.vmem [shape: f32[64,32], index: 1, kind: input, shape index: {}]   ;;  %s245_s2 = inlined_call_operand.hbm [shape: f32[16,32], index: 2, kind: output, shape index: {}]  }
   0x1   :  { %s7_s11 = sshll.u32 %s243_s0, 4  ;;  %s8_s11 = int_to_ptr.vmem [resolvable:$true] %s7_s11 }
   0x2   :  { %s150_s12 = scalar_lea.vmem %s8_s11, 16  ;;  %p155_p1 = scmp.lt.s32.totalorder %s8_s11, %s8_s11 }
   0x3   :  { %p151_p0 = scmp.ne.s32.totalorder %s8_s11, %s150_s12  ;;  %p156_p2 = scmp.lt.s32.totalorder %s150_s12, %s150_s12 }
   0x5   :  { %p157_p3 = por %p156_p2, %p155_p1 }
   0x7   :  { %p158_p4 = pnand %p157_p3, %p151_p0 }
   0x9   :  { %161 = shalt.err (!%p158_p4)  }
   0xa   :  { %s206_s13 = smov [#allocation4]  }
   0xb   :  { %10 = dma.vmem_to_smem %s8_s11, 16, %s206_s13, [#allocation3] }
   0xc   :  { %192 = dma.done.wait [#allocation3], 16 }
   0xd   :  { %193 = vsyncadd [#allocation3], 4294967280 }
   0xe   :  { %12 = sfence }
   0xf   :  { %13 = vsyncpa [#allocation6], 0  ;;  %s198_s14 = smov 0  }
  0x10 LB: > { %s22_s15 = sld [smem:[#allocation4 + %s200_s14]]  ;;  %s24_s18 = scalar_lea.vmem [#allocation5], %s200_s14  ;;  %s200_s14 = sphi %s198_s14, %s20_s14  }
  0x16   : > { %s23_s17 = scalar_lea.vmem %s244_s1, %s22_s15 }
  0x17   : > { %v42_v0 = vld [vmem:[%s23_s17] sm:$0x1] }
  0x18   : > { %43 = vst [vmem:[%s24_s18] sm:$0x1] %v42_v0 }
  0x19   : > { %68 = vsyncadd [#allocation2], 16  ;;  %s20_s14 = sadd.s32 1, %s200_s14  }
  0x1a   : > { %p17_p5 = scmp.ge.s32.totalorder %s20_s14, 16  }
  0x1b   :  { %s202_s19 = smov (%p17_p5), 0  }
  0x1c   :  { %19 = sbr.rel (!%p17_p5) target bundleno = 16 (0x10), region = 76 }
  0x23 LB: > { %194 = dma.done.wait [#allocation2], 16  ;;  %s204_s19 = sphi %s202_s19, %s74_s19  }
  0x24   : > { %195 = vsyncadd [#allocation2], 4294967280  ;;  %s74_s19 = sadd.s32 1, %s204_s19  }
  0x25   : > { %p71_p6 = scmp.ge.s32.totalorder %s74_s19, 16  }
  0x26   :  { %v78_v1 = vld [vmem:[#allocation5] sm:$0xff] (%p71_p6)  ;;  %vm82_vm0 = vcmask (%p71_p6), 261120   ;;  %v79_v2 = vld [vmem:[#allocation5 + $0x8] sm:$0xff] (%p71_p6)  ;;  %s207_s20 = smov (%p71_p6), [#allocation5]  }
  0x27   :  { %73 = sbr.rel (!%p71_p6) target bundleno = 35 (0x23), region = 87  ;;  %v80_v3 = vmul.f32 (%p71_p6), 5.656854, %v78_v1  ;;  %v81_v4 = vmul.f32 (%p71_p6), 5.656854, %v79_v2  ;;  %s90_s21 = sshll.u32 (%p71_p6), %s207_s20, 4  ;;  %s91_s21 = int_to_ptr.vmem [resolvable:$true] %s90_s21 }
  0x28   :  { %s162_s1 = scalar_lea.vmem (%p71_p6), %s91_s21, 256  ;;  %p167_p8 = scmp.lt.s32.totalorder (%p71_p6), %s91_s21, %s91_s21 }
  0x29   :  { %83 = vst.msk [vmem:[#allocation5] sm:$0xff] (%p71_p6), %vm82_vm0, %v80_v3  ;;  %84 = vst.msk [vmem:[#allocation5 + $0x8] sm:$0xff] (%p71_p6), %vm82_vm0, %v81_v4  ;;  %p163_p7 = scmp.ne.s32.totalorder (%p71_p6), %s91_s21, %s162_s1  ;;  %p168_p9 = scmp.lt.s32.totalorder (%p71_p6), %s162_s1, %s162_s1 }
  0x2b   :  { %p169_p10 = por (%p71_p6), %p168_p9, %p167_p8 }
  0x2d   :  { %p170_p11 = pnand (%p71_p6), %p169_p10, %p163_p7 }
  0x2f   :  { %173 = shalt.err (!%p170_p11)
}
  0x30   :  { %s174_s24 = scalar_lea.hbm %s245_s2, 256 }
  0x31   :  { %p175_p12 = scmp.ne.s32.totalorder %s245_s2, %s174_s24  ;;  %p178_p13 = scmp.lt.u32.totalorder %s174_s24, %s245_s2 }
  0x33   :  { %p180_p0 = pnand %p178_p13, %p175_p12 }
  0x35   :  { %183 = shalt.err (!%p180_p0)
}
  0x36   :  { %s208_s29 = smov 128   ;;  %s209_s30 = smov 8  }
  0x37   :  { %96 = dma.vmem_to_hbm [thread:$0]  %s91_s21, 256, %s245_s2, [#allocation6], %s208_s29, %s208_s29, %s209_s30  }
  0x38   :  { %196 = dma.done.wait [#allocation6], 256  }
  0x39   :  { %197 = vsyncadd [#allocation6], 4294967040 }
  0x3a   :  { %100 = vsyncpa [#allocation6], 1 }
  0x3b   :  { %101 = vsyncmov [#allocation2] }
  0x3e   :  { %s102_s5 = vpop.sfrf %101 }
  0x3f   :  { %p129_p1 = scmp.ne.s32.totalorder %s102_s5, 0 }
  0x41   :  { %106 = shalt.err (%p129_p1)  }

</bundles_post_ra>
